<compile_context>
chip_gen: v7x
topology: tpu7x:2x2x1
jax: 0.10.0
libtpu: 0.0.40
codegen_flags: <defaults>
</compile_context>

<pallas_src>
import functools

import jax
import jax.numpy as jnp
from jax.experimental import pallas as pl
from jax.experimental.pallas import tpu as pltpu

N_EMBD = 64 * 3          # 192
HIDDEN = 4 * N_EMBD      # 768
DROPOUT = 0.0            # p = 0.0 -> identity at train/eval alike


def _round_up(n, m):
    return ((n + m - 1) // m) * m


def ffn_kernel(x_ref, w1_ref, b1_ref, w2_ref, b2_ref, o_ref):
    # Fused: relu(x @ W1 + b1) @ W2 + b2.   Dropout with p=0.0 is a no-op.
    x = x_ref[...]                                                    # bf16 (tm, Cp)
    h = jnp.dot(x, w1_ref[...], preferred_element_type=jnp.float32)   # MXU, f32 acc
    h = jnp.maximum(h + b1_ref[...], 0.0)                             # f32 epilogue
    y = jnp.dot(h.astype(w2_ref.dtype), w2_ref[...],
                preferred_element_type=jnp.float32)                   # MXU, f32 acc
    o_ref[...] = (y + b2_ref[...]).astype(o_ref.dtype)


@functools.partial(jax.jit, static_argnames=("tm",))
def feed_forward(x, w1, b1, w2, b2, *, tm=256):
    """x: (B, T, C) float32. w1: (C, H), b1: (H,), w2: (H, C), b2: (C,)."""
    B, T, C = x.shape
    H = w1.shape[1]
    M = B * T

    # Lane-pad channel dims to multiples of 128 (192 -> 256) for dense vregs and
    # unmasked output stores. Zero-padded weight rows make the padded x lanes inert.
    Cp = _round_up(C, 128)
    Hp = _round_up(H, 128)

    # Row tiling: one block for small problems, else tiles of `tm` rows.
    # tm is a multiple of 16 (bf16 (16,128) sublane tile); remainder rows are
    # zero-padded and sliced off afterwards.
    Mp = _round_up(M, 16)
    tm_eff = Mp if Mp <= tm else tm
    Mp = _round_up(Mp, tm_eff)
    n_steps = Mp // tm_eff

    # bf16 matmul operands (accumulation stays f32 in-kernel); biases in f32.
    x2 = jnp.zeros((Mp, Cp), jnp.bfloat16).at[:M, :C].set(
        x.reshape(M, C).astype(jnp.bfloat16))
    w1p = jnp.zeros((Cp, Hp), jnp.bfloat16).at[:C, :H].set(w1.astype(jnp.bfloat16))
    w2p = jnp.zeros((Hp, Cp), jnp.bfloat16).at[:H, :C].set(w2.astype(jnp.bfloat16))
    b1p = jnp.zeros((1, Hp), jnp.float32).at[0, :H].set(b1.astype(jnp.float32))
    b2p = jnp.zeros((1, Cp), jnp.float32).at[0, :C].set(b2.astype(jnp.float32))

    cost = pl.CostEstimate(
        flops=2 * 2 * Mp * Cp * Hp,                     # two matmuls
        transcendentals=0,
        bytes_accessed=(x2.size + w1p.size + w2p.size) * 2
        + (b1p.size + b2p.size + Mp * Cp) * 4,
    )

    out2 = pl.pallas_call(
        ffn_kernel,
        out_shape=jax.ShapeDtypeStruct((Mp, Cp), jnp.float32),
        grid_spec=pltpu.PrefetchScalarGridSpec(
            num_scalar_prefetch=0,
            grid=(n_steps,),
            in_specs=[
                pl.BlockSpec((tm_eff, Cp), lambda i: (i, 0)),   # x row tile
                pl.BlockSpec((Cp, Hp), lambda i: (0, 0)),       # W1 (resident)
                pl.BlockSpec((1, Hp), lambda i: (0, 0)),        # b1 (resident)
                pl.BlockSpec((Hp, Cp), lambda i: (0, 0)),       # W2 (resident)
                pl.BlockSpec((1, Cp), lambda i: (0, 0)),        # b2 (resident)
            ],
            out_specs=pl.BlockSpec((tm_eff, Cp), lambda i: (i, 0)),
        ),
        compiler_params=pltpu.CompilerParams(
            dimension_semantics=("parallel",),
        ),
        cost_estimate=cost,
    )(x2, w1p, b1p, w2p, b2p)

    return out2[:M, :C].reshape(B, T, C)


def reference(x, w1, b1, w2, b2):
    h = jnp.maximum(x @ w1 + b1, 0.0)
    return h @ w2 + b2


if __name__ == "__main__":
    key = jax.random.PRNGKey(0)
    k_x, k_w1, k_b1, k_w2, k_b2 = jax.random.split(key, 5)

    B, T = 2, 8
    x = jax.random.normal(k_x, (B, T, N_EMBD), dtype=jnp.float32)

    # Deterministic init mimicking nn.Linear's uniform(-1/sqrt(fan_in), 1/sqrt(fan_in)).
    bound1 = 1.0 / (N_EMBD ** 0.5)
    bound2 = 1.0 / (HIDDEN ** 0.5)
    w1 = jax.random.uniform(k_w1, (N_EMBD, HIDDEN), jnp.float32, -bound1, bound1)
    b1 = jax.random.uniform(k_b1, (HIDDEN,), jnp.float32, -bound1, bound1)
    w2 = jax.random.uniform(k_w2, (HIDDEN, N_EMBD), jnp.float32, -bound2, bound2)
    b2 = jax.random.uniform(k_b2, (N_EMBD,), jnp.float32, -bound2, bound2)

    out = feed_forward(x, w1, b1, w2, b2)
    out = jax.block_until_ready(out)

    ref = reference(x, w1, b1, w2, b2)
    assert out.shape == (B, T, N_EMBD)
    # bf16 matmul operands with f32 accumulation: tolerance loosened vs. f32 ref.
    assert jnp.allclose(out, ref, atol=3e-2, rtol=3e-2)

    print("KERNEL_OK")
</pallas_src>

<mosaic_0001>
module attributes {stable_mosaic.version = 11 : i64} {
  func.func @ffn_kernel(%arg0: i32, %arg1: memref<16x256xbf16, #tpu.memory_space<vmem>>, %arg2: memref<256x768xbf16, #tpu.memory_space<vmem>>, %arg3: memref<1x768xf32, #tpu.memory_space<vmem>>, %arg4: memref<768x256xbf16, #tpu.memory_space<vmem>>, %arg5: memref<1x256xf32, #tpu.memory_space<vmem>>, %arg6: memref<16x256xf32, #tpu.memory_space<vmem>>) attributes {dimension_semantics = [#tpu.dimension_semantics<parallel>], iteration_bounds = array<i64: 1>, scalar_prefetch = 0 : i64, scratch_operands = 0 : i64, tpu.core_type = #tpu.core_type<tc>, window_params = [{transform_indices = @transform_0, window_bounds = array<i64: 16, 256>}, {pipeline_mode = #tpu.pipeline_mode<synchronous>, transform_indices = @transform_1, window_bounds = array<i64: 256, 768>}, {pipeline_mode = #tpu.pipeline_mode<synchronous>, transform_indices = @transform_2, window_bounds = array<i64: 1, 768>}, {pipeline_mode = #tpu.pipeline_mode<synchronous>, transform_indices = @transform_3, window_bounds = array<i64: 768, 256>}, {pipeline_mode = #tpu.pipeline_mode<synchronous>, transform_indices = @transform_4, window_bounds = array<i64: 1, 256>}, {transform_indices = @transform_5, window_bounds = array<i64: 16, 256>}]} {
    %c0 = arith.constant 0 : index
    %c0_0 = arith.constant 0 : index
    %0 = vector.load %arg1[%c0, %c0_0] : memref<16x256xbf16, #tpu.memory_space<vmem>>, vector<16x256xbf16>
    %c0_1 = arith.constant 0 : index
    %c0_2 = arith.constant 0 : index
    %1 = vector.load %arg2[%c0_1, %c0_2] : memref<256x768xbf16, #tpu.memory_space<vmem>>, vector<256x768xbf16>
    %cst = arith.constant dense<0.000000e+00> : vector<16x768xf32>
    %2 = tpu.matmul %0, %1, %cst {dimension_numbers = #tpu.dot_dimension_numbers<[1], [0], [0], [1], [0, 0, 1, 1], [], []>} : vector<16x256xbf16>, vector<256x768xbf16>, vector<16x768xf32> -> vector<16x768xf32>
    %c0_3 = arith.constant 0 : index
    %c0_4 = arith.constant 0 : index
    %3 = vector.load %arg3[%c0_3, %c0_4] : memref<1x768xf32, #tpu.memory_space<vmem>>, vector<1x768xf32>
    %4 = vector.broadcast %3 : vector<1x768xf32> to vector<16x768xf32>
    %5 = arith.addf %2, %4 : vector<16x768xf32>
    %cst_5 = arith.constant 0.000000e+00 : f32
    %6 = vector.broadcast %cst_5 : f32 to vector<16x768xf32>
    %7 = arith.maximumf %5, %6 : vector<16x768xf32>
    %8 = arith.truncf %7 : vector<16x768xf32> to vector<16x768xbf16>
    %c0_6 = arith.constant 0 : index
    %c0_7 = arith.constant 0 : index
    %9 = vector.load %arg4[%c0_6, %c0_7] : memref<768x256xbf16, #tpu.memory_space<vmem>>, vector<768x256xbf16>
    %cst_8 = arith.constant dense<0.000000e+00> : vector<16x256xf32>
    %10 = tpu.matmul %8, %9, %cst_8 {dimension_numbers = #tpu.dot_dimension_numbers<[1], [0], [0], [1], [0, 0, 1, 1], [], []>} : vector<16x768xbf16>, vector<768x256xbf16>, vector<16x256xf32> -> vector<16x256xf32>
    %c0_9 = arith.constant 0 : index
    %c0_10 = arith.constant 0 : index
    %11 = vector.load %arg5[%c0_9, %c0_10] : memref<1x256xf32, #tpu.memory_space<vmem>>, vector<1x256xf32>
    %12 = vector.broadcast %11 : vector<1x256xf32> to vector<16x256xf32>
    %13 = arith.addf %10, %12 : vector<16x256xf32>
    %c0_11 = arith.constant 0 : index
    %c0_12 = arith.constant 0 : index
    %14 = vector.load %arg6[%c0_11, %c0_12] : memref<16x256xf32, #tpu.memory_space<vmem>>, vector<16x256xf32>
    tpu.vector_store %arg6[%c0_11, %c0_12], %13 {strides = array<i32>} : memref<16x256xf32, #tpu.memory_space<vmem>>, vector<16x256xf32>,
    return
  }
  func.func @transform_0(%arg0: i32) -> (i32, i32) {
    %c0_i32 = arith.constant 0 : i32
    %c0_i32_0 = arith.constant 0 : i32
    return %arg0, %c0_i32 : i32, i32
  }
  func.func @transform_1(%arg0: i32) -> (i32, i32) {
    %c0_i32 = arith.constant 0 : i32
    %c0_i32_0 = arith.constant 0 : i32
    %c0_i32_1 = arith.constant 0 : i32
    return %c0_i32, %c0_i32_0 : i32, i32
  }
  func.func @transform_2(%arg0: i32) -> (i32, i32) {
    %c0_i32 = arith.constant 0 : i32
    %c0_i32_0 = arith.constant 0 : i32
    %c0_i32_1 = arith.constant 0 : i32
    return %c0_i32, %c0_i32_0 : i32, i32
  }
  func.func @transform_3(%arg0: i32) -> (i32, i32) {
    %c0_i32 = arith.constant 0 : i32
    %c0_i32_0 = arith.constant 0 : i32
    %c0_i32_1 = arith.constant 0 : i32
    return %c0_i32, %c0_i32_0 : i32, i32
  }
  func.func @transform_4(%arg0: i32) -> (i32, i32) {
    %c0_i32 = arith.constant 0 : i32
    %c0_i32_0 = arith.constant 0 : i32
    %c0_i32_1 = arith.constant 0 : i32
    return %c0_i32, %c0_i32_0 : i32, i32
  }
  func.func @transform_5(%arg0: i32) -> (i32, i32) {
    %c0_i32 = arith.constant 0 : i32
    %c0_i32_0 = arith.constant 0 : i32
    return %arg0, %c0_i32 : i32, i32
  }
}

</mosaic_0001>

<bundles_post_ra>
// kernel: feed_forward.1
= control target key start
LH: loop header
LB: loop body
LE: loop exit
PB: predicated region body
PF: predicated region fallthrough
CT: control target
= control target key end

     0   :  { %s2673_s1 = inlined_call_operand.vmem [shape: bf16[256,768], index: 1, kind: input, shape index: {}]   ;;  %s2674_s0 = inlined_call_operand.vmem [shape: bf16[16,256], index: 0, kind: input, shape index: {}]   ;;  %s2675_s3 = inlined_call_operand.vmem [shape: bf16[768,256], index: 3, kind: input, shape index: {}]   ;;  %s2676_s2 = inlined_call_operand.vmem [shape: f32[1,768], index: 2, kind: input, shape index: {}]   ;;  %s2677_s4 = inlined_call_operand.vmem [shape: f32[1,256], index: 4, kind: input, shape index: {}]   ;;  %s2678_s5 = inlined_call_operand.vmem [shape: f32[16,256], index: 5, kind: output, shape index: {}]  }
   0x1   :  { %v1718_v0 = vld [vmem:[%s2673_s1 + $0x4] ss:$24 sps:$4 sm:$0xff]   ;;  %v1720_v1 = vld [vmem:[%s2673_s1] ss:$24 sps:$4 sm:$0xff]   ;;  %v1721_v2 = vld [vmem:[%s2673_s1 + $0x34] ss:$24 sps:$4 sm:$0xff]  }
   0x2   :  { %640 = vmatprep.subr.bf16.mxu0 %v1718_v0  ;;  %v1723_v3 = vld [vmem:[%s2673_s1 + $0x30] ss:$24 sps:$4 sm:$0xff]   ;;  %v1724_v4 = vld [vmem:[%s2673_s1 + $0x64] ss:$24 sps:$4 sm:$0xff]   ;;  %v1726_v5 = vld [vmem:[%s2673_s1 + $0x60] ss:$24 sps:$4 sm:$0xff]  }
   0x3   :  { %641 = vmatpush1.bf16.msra.mxu0 %v1720_v1  ;;  %v1727_v6 = vld [vmem:[%s2673_s1 + $0x94] ss:$24 sps:$4 sm:$0xff]   ;;  %v1729_v7 = vld [vmem:[%s2673_s1 + $0x90] ss:$24 sps:$4 sm:$0xff]   ;;  %v1730_v8 = vld [vmem:[%s2673_s1 + $0xc4] ss:$24 sps:$4 sm:$0xff]  }
   0x4   :  { %642 = vmatprep.subr.bf16.mxu0 %v1721_v2  ;;  %v1732_v9 = vld [vmem:[%s2673_s1 + $0xc0] ss:$24 sps:$4 sm:$0xff]   ;;  %v1733_v10 = vld [vmem:[%s2673_s1 + $0xf4] ss:$24 sps:$4 sm:$0xff]   ;;  %v1735_v11 = vld [vmem:[%s2673_s1 + $0xf0] ss:$24 sps:$4 sm:$0xff]  }
   0x5   :  { %v1736_v12 = vld [vmem:[%s2673_s1 + $0x124] ss:$24 sps:$4 sm:$0xff]   ;;  %v1738_v14 = vld [vmem:[%s2673_s1 + $0x120] ss:$24 sps:$4 sm:$0xff]   ;;  %v1739_v15 = vld [vmem:[%s2673_s1 + $0x154] ss:$24 sps:$4 sm:$0xff]  }
   0x6   :  { %v2081_v13 = vld [vmem:[%s2674_s0 + $0x4] ss:$8 sps:$4 sm:$0xff]   ;;  %v1741_v16 = vld [vmem:[%s2673_s1 + $0x150] ss:$24 sps:$4 sm:$0xff]   ;;  %v1744_v18 = vld [vmem:[%s2673_s1 + $0x180] ss:$24 sps:$4 sm:$0xff]  }
   0x7   :  { %643 = vmatpush1.bf16.msra.mxu0 %v1723_v3  ;;  %672 = vmatprep.mubr.bf16.mxu0 %v2081_v13  ;;  %v1742_v17 = vld [vmem:[%s2673_s1 + $0x184] ss:$24 sps:$4 sm:$0xff]   ;;  %v1745_v19 = vld [vmem:[%s2673_s1 + $0x1b4] ss:$24 sps:$4 sm:$0xff]   ;;  %v1747_v20 = vld [vmem:[%s2673_s1 + $0x1b0] ss:$24 sps:$4 sm:$0xff]  }
   0x8   :  { %644 = vmatprep.subr.bf16.mxu0 %v1724_v4  ;;  %v1748_v21 = vld [vmem:[%s2673_s1 + $0x1e4] ss:$24 sps:$4 sm:$0xff]   ;;  %v1750_v22 = vld [vmem:[%s2673_s1 + $0x1e0] ss:$24 sps:$4 sm:$0xff]   ;;  %v1751_v23 = vld [vmem:[%s2673_s1 + $0x214] ss:$24 sps:$4 sm:$0xff]  }
   0x9   :  { %v1753_v24 = vld [vmem:[%s2673_s1 + $0x210] ss:$24 sps:$4 sm:$0xff]   ;;  %v1754_v25 = vld [vmem:[%s2673_s1 + $0x244] ss:$24 sps:$4 sm:$0xff]   ;;  %v1756_v26 = vld [vmem:[%s2673_s1 + $0x240] ss:$24 sps:$4 sm:$0xff]  }
   0xa   :  { %v1757_v27 = vld [vmem:[%s2673_s1 + $0x274] ss:$24 sps:$4 sm:$0xff]   ;;  %v1759_v28 = vld [vmem:[%s2673_s1 + $0x270] ss:$24 sps:$4 sm:$0xff]   ;;  %v1760_v29 = vld [vmem:[%s2673_s1 + $0x2a4] ss:$24 sps:$4 sm:$0xff]  }
   0xb   :  { %645 = vmatpush1.bf16.msra.mxu0 %v1726_v5  ;;  %v1762_v30 = vld [vmem:[%s2673_s1 + $0x2a0] ss:$24 sps:$4 sm:$0xff]   ;;  %v1763_v31 = vld [vmem:[%s2673_s1 + $0x2d4] ss:$24 sps:$4 sm:$0xff]   ;;  %v1765_v32 = vld [vmem:[%s2673_s1 + $0x2d0] ss:$24 sps:$4 sm:$0xff]  }
   0xc   :  { %646 = vmatprep.subr.bf16.mxu0 %v1727_v6  ;;  %v1771_v33 = vld [vmem:[%s2673_s1 + $0xc] ss:$24 sps:$4 sm:$0xff]   ;;  %v2147_v34 = vld [vmem:[%s2674_s0] ss:$8 sps:$4 sm:$0xff]   ;;  %v1774_v36 = vld [vmem:[%s2673_s1 + $0x3c] ss:$24 sps:$4 sm:$0xff]  }
   0xd   :  { %v1769_v35 = vld [vmem:[%s2673_s1 + $0x8] ss:$24 sps:$4 sm:$0xff]   ;;  %v1772_v37 = vld [vmem:[%s2673_s1 + $0x38] ss:$24 sps:$4 sm:$0xff]   ;;  %v1777_v38 = vld [vmem:[%s2673_s1 + $0x6c] ss:$24 sps:$4 sm:$0xff]  }
   0xe   :  { %v1865_v39 = vld [vmem:[%s2675_s3 + $0x4] ss:$8 sps:$4 sm:$0xff]   ;;  %v1867_v40 = vld [vmem:[%s2675_s3] ss:$8 sps:$4 sm:$0xff]   ;;  %v1868_v41 = vld [vmem:[%s2675_s3 + $0x14] ss:$8 sps:$4 sm:$0xff]  }
   0xf   :  { %647 = vmatpush1.bf16.msra.mxu0 %v1729_v7  ;;  %1375 = vmatprep.subr.bf16.mxu1 %v1865_v39  ;;  %v1775_v42 = vld [vmem:[%s2673_s1 + $0x68] ss:$24 sps:$4 sm:$0xff]   ;;  %v1870_v43 = vld [vmem:[%s2675_s3 + $0x10] ss:$8 sps:$4 sm:$0xff]   ;;  %v1871_v44 = vld [vmem:[%s2675_s3 + $0x24] ss:$8 sps:$4 sm:$0xff]  }
  0x10   :  { %648 = vmatprep.subr.bf16.mxu0 %v1730_v8  ;;  %1376 = vmatpush1.bf16.msra.mxu1 %v1867_v40  ;;  %v1780_v45 = vld [vmem:[%s2673_s1 + $0x9c] ss:$24 sps:$4 sm:$0xff]   ;;  %v1778_v46 = vld [vmem:[%s2673_s1 + $0x98] ss:$24 sps:$4 sm:$0xff]   ;;  %v1873_v47 = vld [vmem:[%s2675_s3 + $0x20] ss:$8 sps:$4 sm:$0xff]  }
  0x11   :  { %1377 = vmatprep.subr.bf16.mxu1 %v1868_v41  ;;  %v1874_v48 = vld [vmem:[%s2675_s3 + $0x34] ss:$8 sps:$4 sm:$0xff]   ;;  %v1783_v49 = vld [vmem:[%s2673_s1 + $0xcc] ss:$24 sps:$4 sm:$0xff]   ;;  %v1781_v50 = vld [vmem:[%s2673_s1 + $0xc8] ss:$24 sps:$4 sm:$0xff]  }
  0x12   :  { %v1876_v51 = vld [vmem:[%s2675_s3 + $0x30] ss:$8 sps:$4 sm:$0xff]   ;;  %v1877_v52 = vld [vmem:[%s2675_s3 + $0x44] ss:$8 sps:$4 sm:$0xff]   ;;  %v1786_v53 = vld [vmem:[%s2673_s1 + $0xfc] ss:$24 sps:$4 sm:$0xff]  }
  0x13   :  { %649 = vmatpush1.bf16.msra.mxu0 %v1732_v9  ;;  %v1784_v54 = vld [vmem:[%s2673_s1 + $0xf8] ss:$24 sps:$4 sm:$0xff]   ;;  %v1879_v55 = vld [vmem:[%s2675_s3 + $0x40] ss:$8 sps:$4 sm:$0xff]   ;;  %v1880_v56 = vld [vmem:[%s2675_s3 + $0x54] ss:$8 sps:$4 sm:$0xff]  }
  0x14   :  { %650 = vmatprep.subr.bf16.mxu0 %v1733_v10  ;;  %1378 = vmatpush1.bf16.msra.mxu1 %v1870_v43  ;;  %v1789_v57 = vld [vmem:[%s2673_s1 + $0x12c] ss:$24 sps:$4 sm:$0xff]   ;;  %v1787_v58 = vld [vmem:[%s2673_s1 + $0x128] ss:$24 sps:$4 sm:$0xff]   ;;  %v1882_v59 = vld [vmem:[%s2675_s3 + $0x50] ss:$8 sps:$4 sm:$0xff]  }
  0x15   :  { %1379 = vmatprep.subr.bf16.mxu1 %v1871_v44  ;;  %v1883_v60 = vld [vmem:[%s2675_s3 + $0x64] ss:$8 sps:$4 sm:$0xff]   ;;  %v1792_v61 = vld [vmem:[%s2673_s1 + $0x15c] ss:$24 sps:$4 sm:$0xff]   ;;  %v1885_v62 = vld [vmem:[%s2675_s3 + $0x60] ss:$8 sps:$4 sm:$0xff]  }
  0x16   :  { %v1790_v63 = vld [vmem:[%s2673_s1 + $0x158] ss:$24 sps:$4 sm:$0xff]   ;;  %v1886_v0 = vld [vmem:[%s2675_s3 + $0x74] ss:$8 sps:$4 sm:$0xff]   ;;  %v1795_v1 = vld [vmem:[%s2673_s1 + $0x18c] ss:$24 sps:$4 sm:$0xff]  }
  0x17   :  { %651 = vmatpush1.bf16.msra.mxu0 %v1735_v11  ;;  %v1888_v2 = vld [vmem:[%s2675_s3 + $0x70] ss:$8 sps:$4 sm:$0xff]   ;;  %v1793_v3 = vld [vmem:[%s2673_s1 + $0x188] ss:$24 sps:$4 sm:$0xff]   ;;  %v1889_v4 = vld [vmem:[%s2675_s3 + $0x84] ss:$8 sps:$4 sm:$0xff]  }
  0x18   :  { %652 = vmatprep.subr.bf16.mxu0 %v1736_v12  ;;  %1380 = vmatpush1.bf16.msra.mxu1 %v1873_v47  ;;  %v1798_v5 = vld [vmem:[%s2673_s1 + $0x1bc] ss:$24 sps:$4 sm:$0xff]   ;;  %v1891_v6 = vld [vmem:[%s2675_s3 + $0x80] ss:$8 sps:$4 sm:$0xff]   ;;  %v1796_v7 = vld [vmem:[%s2673_s1 + $0x1b8] ss:$24 sps:$4 sm:$0xff]  }
  0x19   :  { %1381 = vmatprep.subr.bf16.mxu1 %v1874_v48  ;;  %v1892_v8 = vld [vmem:[%s2675_s3 + $0x94] ss:$8 sps:$4 sm:$0xff]   ;;  %v1801_v9 = vld [vmem:[%s2673_s1 + $0x1ec] ss:$24 sps:$4 sm:$0xff]   ;;  %v1894_v10 = vld [vmem:[%s2675_s3 + $0x90] ss:$8 sps:$4 sm:$0xff]  }
  0x1a   :  { %v1799_v11 = vld [vmem:[%s2673_s1 + $0x1e8] ss:$24 sps:$4 sm:$0xff]   ;;  %v1895_v12 = vld [vmem:[%s2675_s3 + $0xa4] ss:$8 sps:$4 sm:$0xff]   ;;  %v1910_v48 = vld [vmem:[%s2675_s3 + $0xf4] ss:$8 sps:$4 sm:$0xff]  }
  0x1b   :  { %653 = vmatpush1.bf16.msra.mxu0 %v1738_v14  ;;  %v1804_v14 = vld [vmem:[%s2673_s1 + $0x21c] ss:$24 sps:$4 sm:$0xff]   ;;  %v1829_v39 = vld [vmem:[%s2673_s1 + $0xd0] ss:$24 sps:$4 sm:$0xff]   ;;  %v1832_v41 = vld [vmem:[%s2673_s1 + $0x100] ss:$24 sps:$4 sm:$0xff]  }
  0x1c   :  { %654 = vmatprep.subr.bf16.mxu0 %v1739_v15  ;;  %1382 = vmatpush1.bf16.msra.mxu1 %v1876_v51  ;;  %v1897_v15 = vld [vmem:[%s2675_s3 + $0xa0] ss:$8 sps:$4 sm:$0xff]   ;;  %v1834_v40 = vld [vmem:[%s2673_s1 + $0x104] ss:$24 sps:$4 sm:$0xff]   ;;  %v1837_v43 = vld [vmem:[%s2673_s1 + $0x134] ss:$24 sps:$4 sm:$0xff]  }
  0x1d   :  { %1383 = vmatprep.subr.bf16.mxu1 %v1877_v52  ;;  %v1907_v44 = vld [vmem:[%s2675_s3 + $0xe4] ss:$8 sps:$4 sm:$0xff]  }
  0x1e   :  { %v1840_v47 = vld [vmem:[%s2673_s1 + $0x164] ss:$24 sps:$4 sm:$0xff]   ;;  %v1843_v51 = vld [vmem:[%s2673_s1 + $0x194] ss:$24 sps:$4 sm:$0xff]  }
  0x1f   :  { %655 = vmatpush1.bf16.msra.mxu0 %v1741_v16  ;;  %v1802_v16 = vld [vmem:[%s2673_s1 + $0x218] ss:$24 sps:$4 sm:$0xff]   ;;  %v1915_v52 = vld [vmem:[%s2675_s3 + $0x104] ss:$8 sps:$4 sm:$0xff]  }
  0x20   :  { %656 = vmatprep.subr.bf16.mxu0 %v1742_v17  ;;  %1384 = vmatpush1.bf16.msra.mxu1 %v1879_v55  ;;  %v1898_v17 = vld [vmem:[%s2675_s3 + $0xb4] ss:$8 sps:$4 sm:$0xff]   ;;  %v1844_v55 = vld [vmem:[%s2673_s1 + $0x1c0] ss:$24 sps:$4 sm:$0xff]  }
  0x21   :  { %1385 = vmatprep.subr.bf16.mxu1 %v1880_v56  ;;  %v1849_v56 = vld [vmem:[%s2673_s1 + $0x1f4] ss:$24 sps:$4 sm:$0xff]  }
  0x23   :  { %657 = vmatpush1.bf16.msra.mxu0 %v1744_v18  ;;  %v1807_v18 = vld [vmem:[%s2673_s1 + $0x24c] ss:$24 sps:$4 sm:$0xff]  }
  0x24   :  { %658 = vmatprep.subr.bf16.mxu0 %v1745_v19  ;;  %1386 = vmatpush1.bf16.msra.mxu1 %v1882_v59  ;;  %v1900_v19 = vld [vmem:[%s2675_s3 + $0xb0] ss:$8 sps:$4 sm:$0xff]  }
  0x25   :  { %1387 = vmatprep.subr.bf16.mxu1 %v1883_v60  ;;  %v1850_v59 = vld [vmem:[%s2673_s1 + $0x220] ss:$24 sps:$4 sm:$0xff]   ;;  %v1855_v60 = vld [vmem:[%s2673_s1 + $0x254] ss:$24 sps:$4 sm:$0xff]  }
  0x27   :  { %659 = vmatpush1.bf16.msra.mxu0 %v1747_v20  ;;  %v1805_v20 = vld [vmem:[%s2673_s1 + $0x248] ss:$24 sps:$4 sm:$0xff]  }
  0x28   :  { %660 = vmatprep.subr.bf16.mxu0 %v1748_v21  ;;  %1388 = vmatpush1.bf16.msra.mxu1 %v1885_v62  ;;  %v1901_v21 = vld [vmem:[%s2675_s3 + $0xc4] ss:$8 sps:$4 sm:$0xff]  }
  0x29   :  { %1389 = vmatprep.subr.bf16.mxu1 %v1886_v0  ;;  %v1858_v62 = vld [vmem:[%s2673_s1 + $0x284] ss:$24 sps:$4 sm:$0xff]   ;;  %v1861_v0 = vld [vmem:[%s2673_s1 + $0x2b4] ss:$24 sps:$4 sm:$0xff]  }
  0x2b   :  { %661 = vmatpush1.bf16.msra.mxu0 %v1750_v22  ;;  %v1810_v22 = vld [vmem:[%s2673_s1 + $0x27c] ss:$24 sps:$4 sm:$0xff]  }
  0x2c   :  { %662 = vmatprep.subr.bf16.mxu0 %v1751_v23  ;;  %1390 = vmatpush1.bf16.msra.mxu1 %v1888_v2  ;;  %v1903_v23 = vld [vmem:[%s2675_s3 + $0xc0] ss:$8 sps:$4 sm:$0xff]   ;;  %v1864_v2 = vld [vmem:[%s2673_s1 + $0x2e4] ss:$24 sps:$4 sm:$0xff]  }
  0x2d   :  { %1391 = vmatprep.subr.bf16.mxu1 %v1889_v4  ;;  %v120_v4 = vlaneseq }
  0x2f   :  { %663 = vmatpush1.bf16.msra.mxu0 %v1753_v24  ;;  %v1808_v24 = vld [vmem:[%s2673_s1 + $0x278] ss:$24 sps:$4 sm:$0xff]  }
  0x30   :  { %664 = vmatprep.subr.bf16.mxu0 %v1754_v25  ;;  %1392 = vmatpush1.bf16.msra.mxu1 %v1891_v6  ;;  %v1904_v25 = vld [vmem:[%s2675_s3 + $0xd4] ss:$8 sps:$4 sm:$0xff]  }
  0x31   :  { %1393 = vmatprep.subr.bf16.mxu1 %v1892_v8 }
  0x33   :  { %665 = vmatpush1.bf16.msra.mxu0 %v1756_v26  ;;  %v1813_v26 = vld [vmem:[%s2673_s1 + $0x2ac] ss:$24 sps:$4 sm:$0xff]  }
  0x34   :  { %666 = vmatprep.subr.bf16.mxu0 %v1757_v27  ;;  %1394 = vmatpush1.bf16.msra.mxu1 %v1894_v10  ;;  %v1811_v27 = vld [vmem:[%s2673_s1 + $0x2a8] ss:$24 sps:$4 sm:$0xff]  }
  0x35   :  { %1395 = vmatprep.subr.bf16.mxu1 %v1895_v12 }
  0x37   :  { %667 = vmatpush1.bf16.msra.mxu0 %v1759_v28  ;;  %v1816_v28 = vld [vmem:[%s2673_s1 + $0x2dc] ss:$24 sps:$4 sm:$0xff]  }
  0x38   :  { %668 = vmatprep.subr.bf16.mxu0 %v1760_v29  ;;  %1396 = vmatpush1.bf16.msra.mxu1 %v1897_v15  ;;  %v1814_v29 = vld [vmem:[%s2673_s1 + $0x2d8] ss:$24 sps:$4 sm:$0xff]  }
  0x39   :  { %1397 = vmatprep.subr.bf16.mxu1 %v1898_v17 }
  0x3b   :  { %669 = vmatpush1.bf16.msra.mxu0 %v1762_v30  ;;  %v1819_v30 = vld [vmem:[%s2673_s1 + $0x14] ss:$24 sps:$4 sm:$0xff]  }
  0x3c   :  { %670 = vmatprep.subr.bf16.mxu0 %v1763_v31  ;;  %1398 = vmatpush1.bf16.msra.mxu1 %v1900_v19  ;;  %v1817_v31 = vld [vmem:[%s2673_s1 + $0x10] ss:$24 sps:$4 sm:$0xff]  }
  0x3d   :  { %1399 = vmatprep.subr.bf16.mxu1 %v1901_v21 }
  0x3f   :  { %671 = vmatpush1.bf16.msra.mxu0 %v1765_v32  ;;  %v1822_v32 = vld [vmem:[%s2673_s1 + $0x44] ss:$24 sps:$4 sm:$0xff]  }
  0x40   :  { %683 = vmatprep.subr.bf16.mxu0 %v1771_v33  ;;  %1400 = vmatpush1.bf16.msra.mxu1 %v1903_v23  ;;  %v1820_v33 = vld [vmem:[%s2673_s1 + $0x40] ss:$24 sps:$4 sm:$0xff]  }
  0x41   :  { %1401 = vmatprep.subr.bf16.mxu1 %v1904_v25  ;;  %v1913_v25 = vld [vmem:[%s2675_s3 + $0x100] ss:$8 sps:$4 sm:$0xff]  }
  0x42   :  { %673 = vmatmul.mubr.bf16.vlgmr.msra.gmra.mrb[0].mxu0 %v2147_v34 }
  0x43   :  { %684 = vmatpush1.bf16.msra.mxu0 %v1769_v35  ;;  %715 = vmatprep.mubr.bf16.mxu0 %v2081_v13  ;;  %v1825_v35 = vld [vmem:[%s2673_s1 + $0x74] ss:$24 sps:$4 sm:$0xff]  }
  0x44   :  { %685 = vmatprep.subr.bf16.mxu0 %v1774_v36  ;;  %v1823_v36 = vld [vmem:[%s2673_s1 + $0x70] ss:$24 sps:$4 sm:$0xff]  }
  0x47   :  { %686 = vmatpush1.bf16.msra.mxu0 %v1772_v37  ;;  %v1828_v37 = vld [vmem:[%s2673_s1 + $0xa4] ss:$24 sps:$4 sm:$0xff]  }
  0x48   :  { %687 = vmatprep.subr.bf16.mxu0 %v1777_v38  ;;  %v1831_v38 = vld [vmem:[%s2673_s1 + $0xd4] ss:$24 sps:$4 sm:$0xff]  }
  0x4b   :  { %688 = vmatpush1.bf16.msra.mxu0 %v1775_v42  ;;  %v1906_v42 = vld [vmem:[%s2675_s3 + $0xd0] ss:$8 sps:$4 sm:$0xff]  }
  0x4c   :  { %689 = vmatprep.subr.bf16.mxu0 %v1780_v45  ;;  %1402 = vmatpush1.bf16.msra.mxu1 %v1906_v42  ;;  %v1835_v45 = vld [vmem:[%s2673_s1 + $0x130] ss:$24 sps:$4 sm:$0xff]   ;;  %v1942_v42 = vld [vmem:[%s2675_s3 + $0x194] ss:$8 sps:$4 sm:$0xff]  }
  0x4d   :  { %1403 = vmatprep.subr.bf16.mxu1 %v1907_v44  ;;  %v1945_v44 = vld [vmem:[%s2675_s3 + $0x1a4] ss:$8 sps:$4 sm:$0xff]  }
  0x4f   :  { %690 = vmatpush1.bf16.msra.mxu0 %v1778_v46  ;;  %v1909_v46 = vld [vmem:[%s2675_s3 + $0xe0] ss:$8 sps:$4 sm:$0xff]  }
  0x50   :  { %691 = vmatprep.subr.bf16.mxu0 %v1783_v49  ;;  %1404 = vmatpush1.bf16.msra.mxu1 %v1909_v46  ;;  %v1838_v49 = vld [vmem:[%s2673_s1 + $0x160] ss:$24 sps:$4 sm:$0xff]   ;;  %v1948_v46 = vld [vmem:[%s2675_s3 + $0x1b4] ss:$8 sps:$4 sm:$0xff]  }
  0x51   :  { %1405 = vmatprep.subr.bf16.mxu1 %v1910_v48  ;;  %v1951_v48 = vld [vmem:[%s2675_s3 + $0x1c4] ss:$8 sps:$4 sm:$0xff]  }
  0x53   :  { %692 = vmatpush1.bf16.msra.mxu0 %v1781_v50  ;;  %v1912_v50 = vld [vmem:[%s2675_s3 + $0xf0] ss:$8 sps:$4 sm:$0xff]  }
  0x54   :  { %693 = vmatprep.subr.bf16.mxu0 %v1786_v53  ;;  %1406 = vmatpush1.bf16.msra.mxu1 %v1912_v50  ;;  %v1841_v53 = vld [vmem:[%s2673_s1 + $0x190] ss:$24 sps:$4 sm:$0xff]   ;;  %v1954_v50 = vld [vmem:[%s2675_s3 + $0x1d4] ss:$8 sps:$4 sm:$0xff]  }
  0x55   :  { %1418 = vmatprep.subr.bf16.mxu1 %v1915_v52 }
  0x57   :  { %694 = vmatpush1.bf16.msra.mxu0 %v1784_v54  ;;  %v1846_v54 = vld [vmem:[%s2673_s1 + $0x1c4] ss:$24 sps:$4 sm:$0xff]  }
  0x58   :  { %695 = vmatprep.subr.bf16.mxu0 %v1789_v57  ;;  %v1847_v57 = vld [vmem:[%s2673_s1 + $0x1f0] ss:$24 sps:$4 sm:$0xff]  }
  0x5b   :  { %696 = vmatpush1.bf16.msra.mxu0 %v1787_v58  ;;  %v1852_v58 = vld [vmem:[%s2673_s1 + $0x224] ss:$24 sps:$4 sm:$0xff]  }
  0x5c   :  { %697 = vmatprep.subr.bf16.mxu0 %v1792_v61  ;;  %v1853_v61 = vld [vmem:[%s2673_s1 + $0x250] ss:$24 sps:$4 sm:$0xff]  }
  0x5f   :  { %698 = vmatpush1.bf16.msra.mxu0 %v1790_v63  ;;  %v1856_v63 = vld [vmem:[%s2673_s1 + $0x280] ss:$24 sps:$4 sm:$0xff]  }
  0x60   :  { %699 = vmatprep.subr.bf16.mxu0 %v1795_v1  ;;  %v1859_v1 = vld [vmem:[%s2673_s1 + $0x2b0] ss:$24 sps:$4 sm:$0xff]  }
  0x63   :  { %700 = vmatpush1.bf16.msra.mxu0 %v1793_v3  ;;  %v1862_v3 = vld [vmem:[%s2673_s1 + $0x2e0] ss:$24 sps:$4 sm:$0xff]  }
  0x64   :  { %701 = vmatprep.subr.bf16.mxu0 %v1798_v5  ;;  %v2442_v5 = vshrl.u32 %v120_v4, 7  ;;  %v1958_v4 = vld [vmem:[%s2675_s3 + $0x1f0] ss:$8 sps:$4 sm:$0xff]  }
  0x66   :  { %v122_v6 = vsub.s32 0, %v2442_v5  ;;  %v126_v8 = vsub.s32 1, %v2442_v5  ;;  %v134_v52 = vsub.s32 3, %v2442_v5 }
  0x67   :  { %702 = vmatpush1.bf16.msra.mxu0 %v1796_v7  ;;  %v2448_v7 = vld [vmem:[%s2676_s2] sm:$0x3f] }
  0x68   :  { %703 = vmatprep.subr.bf16.mxu0 %v1801_v9  ;;  %v123_v9 = vrot.slane %v2448_v7, %v122_v6 }
  0x6b   :  { %704 = vmatpush1.bf16.msra.mxu0 %v1799_v11 }
  0x6c   :  { %705 = vmatprep.subr.bf16.mxu0 %v1804_v14 }
  0x6f   :  { %706 = vmatpush1.bf16.msra.mxu0 %v1802_v16 }
  0x70   :  { %707 = vmatprep.subr.bf16.mxu0 %v1807_v18 }
  0x73   :  { %708 = vmatpush1.bf16.msra.mxu0 %v1805_v20 }
  0x74   :  { %709 = vmatprep.subr.bf16.mxu0 %v1810_v22 }
  0x77   :  { %710 = vmatpush1.bf16.msra.mxu0 %v1808_v24 }
  0x78   :  { %711 = vmatprep.subr.bf16.mxu0 %v1813_v26  ;;  %v1918_v26 = vld [vmem:[%s2675_s3 + $0x114] ss:$8 sps:$4 sm:$0xff]  }
  0x7b   :  { %712 = vmatpush1.bf16.msra.mxu0 %v1811_v27  ;;  %v1916_v27 = vld [vmem:[%s2675_s3 + $0x110] ss:$8 sps:$4 sm:$0xff]  }
  0x7c   :  { %713 = vmatprep.subr.bf16.mxu0 %v1816_v28  ;;  %v1921_v28 = vld [vmem:[%s2675_s3 + $0x124] ss:$8 sps:$4 sm:$0xff]  }
  0x7f   :  { %714 = vmatpush1.bf16.msra.mxu0 %v1814_v29  ;;  %v1919_v29 = vld [vmem:[%s2675_s3 + $0x120] ss:$8 sps:$4 sm:$0xff]  }
  0x80   :  { %726 = vmatprep.subr.bf16.mxu0 %v1819_v30  ;;  %v1924_v30 = vld [vmem:[%s2675_s3 + $0x134] ss:$8 sps:$4 sm:$0xff]  }
  0x82   :  { %716 = vmatmul.mubr.bf16.vlgmr.msra.gmra.mrb[4].mxu0 %v2147_v34 }
  0x83   :  { %727 = vmatpush1.bf16.msra.mxu0 %v1817_v31  ;;  %758 = vmatprep.mubr.bf16.mxu0 %v2081_v13  ;;  %v1826_v13 = vld [vmem:[%s2673_s1 + $0xa0] ss:$24 sps:$4 sm:$0xff]  }
  0x84   :  { %728 = vmatprep.subr.bf16.mxu0 %v1822_v32  ;;  %v1922_v31 = vld [vmem:[%s2675_s3 + $0x130] ss:$8 sps:$4 sm:$0xff]   ;;  %v1927_v32 = vld [vmem:[%s2675_s3 + $0x144] ss:$8 sps:$4 sm:$0xff]  }
  0x87   :  { %729 = vmatpush1.bf16.msra.mxu0 %v1820_v33  ;;  %v1925_v33 = vld [vmem:[%s2675_s3 + $0x140] ss:$8 sps:$4 sm:$0xff]  }
  0x88   :  { %730 = vmatprep.subr.bf16.mxu0 %v1825_v35  ;;  %v1930_v35 = vld [vmem:[%s2675_s3 + $0x154] ss:$8 sps:$4 sm:$0xff]  }
  0x8b   :  { %731 = vmatpush1.bf16.msra.mxu0 %v1823_v36  ;;  %v1928_v36 = vld [vmem:[%s2675_s3 + $0x150] ss:$8 sps:$4 sm:$0xff]  }
  0x8c   :  { %732 = vmatprep.subr.bf16.mxu0 %v1828_v37  ;;  %v1933_v37 = vld [vmem:[%s2675_s3 + $0x164] ss:$8 sps:$4 sm:$0xff]  }
  0x8f   :  { %733 = vmatpush1.bf16.msra.mxu0 %v1826_v13  ;;  %v1931_v13 = vld [vmem:[%s2675_s3 + $0x160] ss:$8 sps:$4 sm:$0xff]  }
  0x90   :  { %734 = vmatprep.subr.bf16.mxu0 %v1831_v38  ;;  %v1936_v38 = vld [vmem:[%s2675_s3 + $0x174] ss:$8 sps:$4 sm:$0xff]  }
  0x93   :  { %735 = vmatpush1.bf16.msra.mxu0 %v1829_v39  ;;  %v1934_v39 = vld [vmem:[%s2675_s3 + $0x170] ss:$8 sps:$4 sm:$0xff]  }
  0x94   :  { %736 = vmatprep.subr.bf16.mxu0 %v1834_v40  ;;  %v1939_v40 = vld [vmem:[%s2675_s3 + $0x184] ss:$8 sps:$4 sm:$0xff]  }
  0x97   :  { %737 = vmatpush1.bf16.msra.mxu0 %v1832_v41  ;;  %v1937_v41 = vld [vmem:[%s2675_s3 + $0x180] ss:$8 sps:$4 sm:$0xff]  }
  0x98   :  { %738 = vmatprep.subr.bf16.mxu0 %v1837_v43  ;;  %v1940_v43 = vld [vmem:[%s2675_s3 + $0x190] ss:$8 sps:$4 sm:$0xff]  }
  0x9b   :  { %739 = vmatpush1.bf16.msra.mxu0 %v1835_v45  ;;  %v1943_v45 = vld [vmem:[%s2675_s3 + $0x1a0] ss:$8 sps:$4 sm:$0xff]  }
  0x9c   :  { %740 = vmatprep.subr.bf16.mxu0 %v1840_v47  ;;  %v1946_v47 = vld [vmem:[%s2675_s3 + $0x1b0] ss:$8 sps:$4 sm:$0xff]  }
  0x9f   :  { %741 = vmatpush1.bf16.msra.mxu0 %v1838_v49  ;;  %v1949_v49 = vld [vmem:[%s2675_s3 + $0x1c0] ss:$8 sps:$4 sm:$0xff]  }
  0xa0   :  { %742 = vmatprep.subr.bf16.mxu0 %v1843_v51  ;;  %v130_v51 = vsub.s32 2, %v2442_v5 }
  0xa3   :  { %743 = vmatpush1.bf16.msra.mxu0 %v1841_v53  ;;  %v1952_v53 = vld [vmem:[%s2675_s3 + $0x1d0] ss:$8 sps:$4 sm:$0xff]  }
  0xa4   :  { %744 = vmatprep.subr.bf16.mxu0 %v1846_v54  ;;  %v131_v54 = vrot.slane %v2448_v7, %v130_v51  ;;  %v2008_v51 = vld [vmem:[%s2675_s3 + $0x2f4] ss:$8 sps:$4 sm:$0xff]  }
  0xa7   :  { %745 = vmatpush1.bf16.msra.mxu0 %v1844_v55  ;;  %v1957_v55 = vld [vmem:[%s2675_s3 + $0x1e4] ss:$8 sps:$4 sm:$0xff]  }
  0xa8   :  { %746 = vmatprep.subr.bf16.mxu0 %v1849_v56  ;;  %v135_v56 = vrot.slane %v2448_v7, %v134_v52 }
  0xab   :  { %747 = vmatpush1.bf16.msra.mxu0 %v1847_v57 }
  0xac   :  { %748 = vmatprep.subr.bf16.mxu0 %v1852_v58  ;;  %v1955_v58 = vld [vmem:[%s2675_s3 + $0x1e0] ss:$8 sps:$4 sm:$0xff]  }
  0xaf   :  { %749 = vmatpush1.bf16.msra.mxu0 %v1850_v59 }
  0xb0   :  { %750 = vmatprep.subr.bf16.mxu0 %v1855_v60 }
  0xb3   :  { %751 = vmatpush1.bf16.msra.mxu0 %v1853_v61  ;;  %v1960_v61 = vld [vmem:[%s2675_s3 + $0x1f4] ss:$8 sps:$4 sm:$0xff]  }
  0xb4   :  { %752 = vmatprep.subr.bf16.mxu0 %v1858_v62 }
  0xb7   :  { %753 = vmatpush1.bf16.msra.mxu0 %v1856_v63 }
  0xb8   :  { %754 = vmatprep.subr.bf16.mxu0 %v1861_v0 }
  0xbb   :  { %755 = vmatpush1.bf16.msra.mxu0 %v1859_v1 }
  0xbc   :  { %756 = vmatprep.subr.bf16.mxu0 %v1864_v2 }
  0xbf   :  { %757 = vmatpush1.bf16.msra.mxu0 %v1862_v3 }
  0xc2   :  { %759 = vmatmul.mubr.bf16.vlgmr.msra.gmra.mrb[8].mxu0 %v2147_v34  ;;  %v127_v34 = vrot.slane %v2448_v7, %v126_v8 }
 0x115   :  { %v674_v10 = vpop.f32.mrb[0].mxu0 }
 0x116   :  { %v675_v11 = vadd.f32 %v674_v10, %v123_v9  ;;  %v676_v12 = vpop.f32.mrb[1].mxu0 }
 0x117   :  { %v677_v14 = vadd.f32 %v676_v12, %v127_v34  ;;  %v678_v15 = vpop.f32.mrb[2].mxu0 }
 0x118   :  { %v769_v16 = vmax.f32 %v675_v11, 0.0  ;;  %v679_v17 = vadd.f32 %v678_v15, %v123_v9  ;;  %v680_v18 = vpop.f32.mrb[3].mxu0  ;;  %v1961_v15 = vld [vmem:[%s2675_s3 + $0x200] ss:$8 sps:$4 sm:$0xff]  }
 0x119   :  { %v681_v19 = vadd.f32 %v680_v18, %v127_v34  ;;  %v770_v21 = vmax.f32 %v677_v14, 0.0  ;;  %v1963_v34 = vld [vmem:[%s2675_s3 + $0x204] ss:$8 sps:$4 sm:$0xff]  }
 0x11a   :  { %v775_v20 = vmax.f32 %v679_v17, 0.0  ;;  %v1964_v17 = vld [vmem:[%s2675_s3 + $0x210] ss:$8 sps:$4 sm:$0xff]   ;;  %v1969_v18 = vld [vmem:[%s2675_s3 + $0x224] ss:$8 sps:$4 sm:$0xff]  }
 0x11b   :  { %v776_v22 = vmax.f32 %v681_v19, 0.0  ;;  %v1967_v19 = vld [vmem:[%s2675_s3 + $0x220] ss:$8 sps:$4 sm:$0xff]  }
 0x11c   :  { %v781_v23 = vpack.c.bf16 %v775_v20, %v769_v16  ;;  %v1966_v16 = vld [vmem:[%s2675_s3 + $0x214] ss:$8 sps:$4 sm:$0xff]  }
 0x11d   :  { %v782_v24 = vpack.c.bf16 %v776_v22, %v770_v21  ;;  %v1972_v20 = vld [vmem:[%s2675_s3 + $0x234] ss:$8 sps:$4 sm:$0xff]   ;;  %v1970_v21 = vld [vmem:[%s2675_s3 + $0x230] ss:$8 sps:$4 sm:$0xff]   ;;  %v1975_v22 = vld [vmem:[%s2675_s3 + $0x244] ss:$8 sps:$4 sm:$0xff]  }
 0x11f   :  { %1407 = vmatprep.mubr.bf16.mxu1 %v782_v24  ;;  %v1978_v24 = vld [vmem:[%s2675_s3 + $0x254] ss:$8 sps:$4 sm:$0xff]  }
 0x120   :  { %1408 = vmatmul.mubr.bf16.vlgmr.msra.gmra.mrb[0].mxu1 %v781_v23  ;;  %v1973_v23 = vld [vmem:[%s2675_s3 + $0x240] ss:$8 sps:$4 sm:$0xff]  }
 0x121   :  { %1419 = vmatpush1.bf16.msra.mxu1 %v1913_v25  ;;  %v1976_v25 = vld [vmem:[%s2675_s3 + $0x250] ss:$8 sps:$4 sm:$0xff]  }
 0x122   :  { %1420 = vmatprep.subr.bf16.mxu1 %v1918_v26  ;;  %v1981_v26 = vld [vmem:[%s2675_s3 + $0x264] ss:$8 sps:$4 sm:$0xff]  }
 0x125   :  { %1421 = vmatpush1.bf16.msra.mxu1 %v1916_v27  ;;  %v1979_v27 = vld [vmem:[%s2675_s3 + $0x260] ss:$8 sps:$4 sm:$0xff]  }
 0x126   :  { %1422 = vmatprep.subr.bf16.mxu1 %v1921_v28  ;;  %v1984_v28 = vld [vmem:[%s2675_s3 + $0x274] ss:$8 sps:$4 sm:$0xff]  }
 0x129   :  { %1423 = vmatpush1.bf16.msra.mxu1 %v1919_v29  ;;  %v1982_v29 = vld [vmem:[%s2675_s3 + $0x270] ss:$8 sps:$4 sm:$0xff]  }
 0x12a   :  { %1424 = vmatprep.subr.bf16.mxu1 %v1924_v30  ;;  %v1987_v30 = vld [vmem:[%s2675_s3 + $0x284] ss:$8 sps:$4 sm:$0xff]  }
 0x12d   :  { %1425 = vmatpush1.bf16.msra.mxu1 %v1922_v31  ;;  %v1985_v31 = vld [vmem:[%s2675_s3 + $0x280] ss:$8 sps:$4 sm:$0xff]  }
 0x12e   :  { %1426 = vmatprep.subr.bf16.mxu1 %v1927_v32  ;;  %v1990_v32 = vld [vmem:[%s2675_s3 + $0x294] ss:$8 sps:$4 sm:$0xff]  }
 0x131   :  { %1427 = vmatpush1.bf16.msra.mxu1 %v1925_v33  ;;  %v1988_v33 = vld [vmem:[%s2675_s3 + $0x290] ss:$8 sps:$4 sm:$0xff]  }
 0x132   :  { %1428 = vmatprep.subr.bf16.mxu1 %v1930_v35  ;;  %v1993_v35 = vld [vmem:[%s2675_s3 + $0x2a4] ss:$8 sps:$4 sm:$0xff]  }
 0x135   :  { %1429 = vmatpush1.bf16.msra.mxu1 %v1928_v36  ;;  %v1991_v36 = vld [vmem:[%s2675_s3 + $0x2a0] ss:$8 sps:$4 sm:$0xff]  }
 0x136   :  { %1430 = vmatprep.subr.bf16.mxu1 %v1933_v37  ;;  %v1996_v37 = vld [vmem:[%s2675_s3 + $0x2b4] ss:$8 sps:$4 sm:$0xff]  }
 0x139   :  { %1431 = vmatpush1.bf16.msra.mxu1 %v1931_v13  ;;  %v1994_v13 = vld [vmem:[%s2675_s3 + $0x2b0] ss:$8 sps:$4 sm:$0xff]  }
 0x13a   :  { %1432 = vmatprep.subr.bf16.mxu1 %v1936_v38  ;;  %v1999_v38 = vld [vmem:[%s2675_s3 + $0x2c4] ss:$8 sps:$4 sm:$0xff]  }
 0x13d   :  { %1433 = vmatpush1.bf16.msra.mxu1 %v1934_v39  ;;  %v1997_v39 = vld [vmem:[%s2675_s3 + $0x2c0] ss:$8 sps:$4 sm:$0xff]  }
 0x13e   :  { %1434 = vmatprep.subr.bf16.mxu1 %v1939_v40  ;;  %v2002_v40 = vld [vmem:[%s2675_s3 + $0x2d4] ss:$8 sps:$4 sm:$0xff]  }
 0x141   :  { %1435 = vmatpush1.bf16.msra.mxu1 %v1937_v41  ;;  %v138_v41 = vsub.s32 4, %v2442_v5 }
 0x142   :  { %1436 = vmatprep.subr.bf16.mxu1 %v1942_v42  ;;  %v142_v42 = vsub.s32 5, %v2442_v5 }
 0x145   :  { %1437 = vmatpush1.bf16.msra.mxu1 %v1940_v43  ;;  %v2000_v43 = vld [vmem:[%s2675_s3 + $0x2d0] ss:$8 sps:$4 sm:$0xff]  }
 0x146   :  { %1438 = vmatprep.subr.bf16.mxu1 %v1945_v44  ;;  %v139_v44 = vrot.slane %v2448_v7, %v138_v41 }
 0x149   :  { %1439 = vmatpush1.bf16.msra.mxu1 %v1943_v45  ;;  %v2005_v45 = vld [vmem:[%s2675_s3 + $0x2e4] ss:$8 sps:$4 sm:$0xff]  }
 0x14a   :  { %1440 = vmatprep.subr.bf16.mxu1 %v1948_v46  ;;  %v143_v46 = vrot.slane %v2448_v7, %v142_v42  ;;  %v2006_v7 = vld [vmem:[%s2675_s3 + $0x2f0] ss:$8 sps:$4 sm:$0xff]  }
 0x14d   :  { %1441 = vmatpush1.bf16.msra.mxu1 %v1946_v47 }
 0x14e   :  { %1442 = vmatprep.subr.bf16.mxu1 %v1951_v48  ;;  %v2003_v48 = vld [vmem:[%s2675_s3 + $0x2e0] ss:$8 sps:$4 sm:$0xff]  }
 0x151   :  { %1443 = vmatpush1.bf16.msra.mxu1 %v1949_v49 }
 0x152   :  { %1444 = vmatprep.subr.bf16.mxu1 %v1954_v50 }
 0x155   :  { %v717_v57 = vpop.f32.mrb[4].mxu0  ;;  %1445 = vmatpush1.bf16.msra.mxu1 %v1952_v53 }
 0x156   :  { %v718_v59 = vadd.f32 %v717_v57, %v131_v54  ;;  %v719_v60 = vpop.f32.mrb[5].mxu0  ;;  %1446 = vmatprep.subr.bf16.mxu1 %v1957_v55 }
 0x157   :  { %v720_v62 = vadd.f32 %v719_v60, %v135_v56  ;;  %v721_v63 = vpop.f32.mrb[6].mxu0 }
 0x158   :  { %v771_v0 = vmax.f32 %v718_v59, 0.0  ;;  %v722_v1 = vadd.f32 %v721_v63, %v131_v54  ;;  %v723_v2 = vpop.f32.mrb[7].mxu0  ;;  %v883_v63 = vld [vmem:[%s2677_s4] sm:$0x3] }
 0x159   :  { %v724_v3 = vadd.f32 %v723_v2, %v135_v56  ;;  %1447 = vmatpush1.bf16.msra.mxu1 %v1955_v58  ;;  %v772_v10 = vmax.f32 %v720_v62, 0.0 }
 0x15a   :  { %v777_v9 = vmax.f32 %v722_v1, 0.0  ;;  %1448 = vmatprep.subr.bf16.mxu1 %v1960_v61  ;;  %v892_v1 = vrot.slane %v883_v63, %v126_v8 }
 0x15b   :  { %v778_v11 = vmax.f32 %v724_v3, 0.0 }
 0x15c   :  { %v783_v12 = vpack.c.bf16 %v777_v9, %v771_v0  ;;  %v888_v0 = vrot.slane %v883_v63, %v122_v6 }
 0x15d   :  { %v784_v14 = vpack.c.bf16 %v778_v11, %v772_v10  ;;  %1449 = vmatpush1.bf16.msra.mxu1 %v1958_v4 }
 0x15e   :  { %1461 = vmatprep.subr.bf16.mxu1 %v1963_v34 }
 0x15f   :  { %1450 = vmatprep.mubr.bf16.mxu1 %v784_v14 }
 0x160   :  { %1451 = vmatmul.mubr.bf16.vlgmr.msra.gmra.mrb[0].mxu1 %v783_v12 }
 0x161   :  { %1462 = vmatpush1.bf16.msra.mxu1 %v1961_v15 }
 0x162   :  { %1463 = vmatprep.subr.bf16.mxu1 %v1966_v16 }
 0x165   :  { %1464 = vmatpush1.bf16.msra.mxu1 %v1964_v17 }
 0x166   :  { %1465 = vmatprep.subr.bf16.mxu1 %v1969_v18 }
 0x169   :  { %1466 = vmatpush1.bf16.msra.mxu1 %v1967_v19 }
 0x16a   :  { %1467 = vmatprep.subr.bf16.mxu1 %v1972_v20 }
 0x16d   :  { %1468 = vmatpush1.bf16.msra.mxu1 %v1970_v21 }
 0x16e   :  { %1469 = vmatprep.subr.bf16.mxu1 %v1975_v22 }
 0x171   :  { %1470 = vmatpush1.bf16.msra.mxu1 %v1973_v23 }
 0x172   :  { %1471 = vmatprep.subr.bf16.mxu1 %v1978_v24 }
 0x175   :  { %1472 = vmatpush1.bf16.msra.mxu1 %v1976_v25 }
 0x176   :  { %1473 = vmatprep.subr.bf16.mxu1 %v1981_v26 }
 0x179   :  { %1474 = vmatpush1.bf16.msra.mxu1 %v1979_v27 }
 0x17a   :  { %1475 = vmatprep.subr.bf16.mxu1 %v1984_v28 }
 0x17d   :  { %1476 = vmatpush1.bf16.msra.mxu1 %v1982_v29 }
 0x17e   :  { %1477 = vmatprep.subr.bf16.mxu1 %v1987_v30 }
 0x181   :  { %1478 = vmatpush1.bf16.msra.mxu1 %v1985_v31 }
 0x182   :  { %1479 = vmatprep.subr.bf16.mxu1 %v1990_v32 }
 0x185   :  { %1480 = vmatpush1.bf16.msra.mxu1 %v1988_v33 }
 0x186   :  { %1481 = vmatprep.subr.bf16.mxu1 %v1993_v35 }
 0x189   :  { %1482 = vmatpush1.bf16.msra.mxu1 %v1991_v36 }
 0x18a   :  { %1483 = vmatprep.subr.bf16.mxu1 %v1996_v37 }
 0x18d   :  { %1484 = vmatpush1.bf16.msra.mxu1 %v1994_v13 }
 0x18e   :  { %1485 = vmatprep.subr.bf16.mxu1 %v1999_v38 }
 0x191   :  { %1486 = vmatpush1.bf16.msra.mxu1 %v1997_v39 }
 0x192   :  { %1487 = vmatprep.subr.bf16.mxu1 %v2002_v40 }
 0x195   :  { %v760_v47 = vpop.f32.mrb[8].mxu0  ;;  %1488 = vmatpush1.bf16.msra.mxu1 %v2000_v43 }
 0x196   :  { %v761_v49 = vadd.f32 %v760_v47, %v139_v44  ;;  %v762_v50 = vpop.f32.mrb[9].mxu0  ;;  %1489 = vmatprep.subr.bf16.mxu1 %v2005_v45 }
 0x197   :  { %v763_v52 = vadd.f32 %v762_v50, %v143_v46  ;;  %v764_v53 = vpop.f32.mrb[10].mxu0 }
 0x198   :  { %v765_v54 = vadd.f32 %v764_v53, %v139_v44  ;;  %v766_v55 = vpop.f32.mrb[11].mxu0  ;;  %v773_v57 = vmax.f32 %v761_v49, 0.0 }
 0x199   :  { %v767_v56 = vadd.f32 %v766_v55, %v143_v46  ;;  %1490 = vmatpush1.bf16.msra.mxu1 %v2003_v48  ;;  %v774_v59 = vmax.f32 %v763_v52, 0.0 }
 0x19a   :  { %v779_v58 = vmax.f32 %v765_v54, 0.0  ;;  %1491 = vmatprep.subr.bf16.mxu1 %v2008_v51 }
 0x19b   :  { %v780_v60 = vmax.f32 %v767_v56, 0.0 }
 0x19c   :  { %v785_v61 = vpack.c.bf16 %v779_v58, %v773_v57 }
 0x19d   :  { %v786_v62 = vpack.c.bf16 %v780_v60, %v774_v59  ;;  %1492 = vmatpush1.bf16.msra.mxu1 %v2006_v7 }
 0x19f   :  { %1493 = vmatprep.mubr.bf16.mxu1 %v786_v62 }
 0x1a0   :  { %1494 = vmatmul.mubr.bf16.vlgmr.msra.gmra.mrb[0].mxu1 %v785_v61 }
 0x273   :  { %v1495_v2 = vpop.f32.mrb[0].mxu1 }
 0x274   :  { %v1706_v3 = vadd.f32 %v1495_v2, %v888_v0  ;;  %v1497_v4 = vpop.f32.mrb[1].mxu1 }
 0x275   :  { %v1707_v9 = vadd.f32 %v1497_v4, %v892_v1  ;;  %v1499_v34 = vpop.f32.mrb[2].mxu1 }
 0x276   :  { %1504 = vst [vmem:[%s2678_s5] sm:$0xff] %v1706_v3  ;;  %v1708_v10 = vadd.f32 %v1499_v34, %v888_v0  ;;  %v1501_v11 = vpop.f32.mrb[3].mxu1 }
 0x277   :  { %1505 = vst [vmem:[%s2678_s5 + $0x8] sm:$0xff] %v1707_v9  ;;  %v1709_v12 = vadd.f32 %v1501_v11, %v892_v1 }
 0x278   :  { %1506 = vst [vmem:[%s2678_s5 + $0x10] sm:$0xff] %v1708_v10 }
 0x279   :  { %1507 = vst [vmem:[%s2678_s5 + $0x18] sm:$0xff] %v1709_v12 }

</bundles_post_ra>
